<compile_context>
chip_gen: v6e
topology: v6e:2x2x1
jax: 0.10.0
libtpu: 0.0.40
codegen_flags: <defaults>
</compile_context>

<pallas_src>
import functools

import jax
import jax.numpy as jnp
import numpy as np
from jax.experimental import pallas as pl
from jax.experimental.pallas import tpu as pltpu


def _round_up(n, m):
    return ((n + m - 1) // m) * m


def _layout(embed_dim, hidden_dim, label_size):
    """Static row/col offsets of the single packed f32 weight buffer."""
    E, H, L = embed_dim, hidden_dim, label_size
    G = 4 * H                                   # packed gate width (i|f|g|o)
    LP = _round_up(max(L, 1), 128)              # lane-dense label width
    width = max(2 * G, LP)
    r_whh = _round_up(E, 8)                     # recurrent weight rows
    r_wl = r_whh + _round_up(H, 8)              # hidden2label rows
    r_bias = r_wl + _round_up(2 * H, 8)         # bias rows (bx, then bl)
    n_rows = _round_up(r_bias + 2, 8)
    return dict(G=G, LP=LP, width=width, r_whh=r_whh, r_wl=r_wl,
                r_bias=r_bias, n_rows=n_rows)


def bilstm_sentiment_kernel(x_ref, w_ref, out_ref, *,
                            seq_len, batch_pad, embed, hidden, lp,
                            r_whh, r_wl, r_bias):
    T, Bp, E, H, LP = seq_len, batch_pad, embed, hidden, lp
    G = 4 * H

    x2d = x_ref[...]                                         # (T*Bp, E)

    # Static views into the single packed weight buffer (no extra DMAs).
    wx = w_ref[0:E, 0:2 * G]                                 # (E, 2G) fwd|bwd gate cols
    whh = w_ref[r_whh:r_whh + H, 0:G]                        # (H, G)
    wl = w_ref[r_wl:r_wl + 2 * H, 0:LP]                      # (2H, LP)
    bx = w_ref[r_bias:r_bias + 1, 0:2 * G]                   # (1, 2G)
    bl = w_ref[r_bias + 1:r_bias + 2, 0:LP]                  # (1, LP)

    # Hoisted input projection: ONE matmul over the whole sequence produces
    # every x-dependent gate pre-activation for BOTH directions.
    xw = jnp.dot(x2d, wx, preferred_element_type=jnp.float32) + bx   # (T*Bp, 2G)

    # Forward recurrence, fully unrolled (T is a static Python int).
    # One lane-packed matmul + 3 transcendental pushes per step.
    h = jnp.zeros((Bp, H), jnp.float32)
    c = jnp.zeros((Bp, H), jnp.float32)
    for t in range(T):
        lo = t * Bp                                          # whole-tile row slice
        gates = xw[lo:lo + Bp, 0:G] + jnp.dot(
            h, whh, preferred_element_type=jnp.float32)      # (Bp, G): i|f|g|o
        s = jax.nn.sigmoid(gates)                            # one EUP pass (i,f,_,o)
        g = jnp.tanh(gates[:, 2 * H:3 * H])
        c = s[:, H:2 * H] * c + s[:, 0:H] * g
        h = s[:, 3 * H:4 * H] * jnp.tanh(c)

    # Backward direction at the last position: zero initial state => exactly
    # one cell step on x[T-1] (f-gate and W_hh term drop out).  Its gate
    # pre-activations come for free from the hoisted projection above.
    gb = xw[(T - 1) * Bp:T * Bp, G:2 * G]                    # (Bp, G)
    sb = jax.nn.sigmoid(gb)
    h_b = sb[:, 3 * H:4 * H] * jnp.tanh(sb[:, 0:H] * jnp.tanh(gb[:, 2 * H:3 * H]))

    # hidden2label (single dot on [h | h_b]) + log_softmax over padded labels.
    y = jnp.dot(jnp.concatenate([h, h_b], axis=-1), wl,
                preferred_element_type=jnp.float32) + bl     # (Bp, LP)
    m = jnp.max(y, axis=-1, keepdims=True)
    lse = jnp.log(jnp.sum(jnp.exp(y - m), axis=-1, keepdims=True)) + m
    out_ref[...] = (y - lse).astype(out_ref.dtype)


@functools.partial(jax.jit, static_argnames=("hidden_dim", "label_size"))
def bilstm_sentiment_forward(x, wbuf, *, hidden_dim, label_size):
    """x: (T, B, E) float32.  wbuf: packed weights from prepare_kernel_params."""
    T, B, E = x.shape
    H = hidden_dim
    lay = _layout(E, H, label_size)

    # Pad batch to a full sublane tile so all per-step row slices are
    # whole-tile; padding rows stay bounded (zero inputs, bounded gates) and
    # are dropped below.
    Bp = _round_up(max(B, 8), 8)
    x_pad = jnp.zeros((T, Bp, E), jnp.float32).at[:, :B, :].set(x)
    x2d = x_pad.reshape(T * Bp, E)                           # free layout change

    vmem = pl.BlockSpec(memory_space=pltpu.MemorySpace.VMEM)
    out = pl.pallas_call(
        functools.partial(
            bilstm_sentiment_kernel, seq_len=T, batch_pad=Bp, embed=E,
            hidden=H, lp=lay["LP"], r_whh=lay["r_whh"], r_wl=lay["r_wl"],
            r_bias=lay["r_bias"]),
        out_shape=jax.ShapeDtypeStruct((Bp, lay["LP"]), jnp.float32),
        in_specs=[vmem, vmem],
        out_specs=vmem,
    )(x2d, wbuf)
    return out[:B, :label_size]


def init_params(key, embedding_dim, hidden_dim, label_size):
    """Raw PyTorch-layout parameters, uniform(-1/sqrt(fan), 1/sqrt(fan)) init."""
    H, E, L = hidden_dim, embedding_dim, label_size
    k = 1.0 / np.sqrt(H)
    keys = jax.random.split(key, 10)
    u = lambda kk, shape, s: jax.random.uniform(kk, shape, jnp.float32, -s, s)
    p = {
        "wih_f": u(keys[0], (4 * H, E), k), "whh_f": u(keys[1], (4 * H, H), k),
        "bih_f": u(keys[2], (4 * H,), k),   "bhh_f": u(keys[3], (4 * H,), k),
        "wih_b": u(keys[4], (4 * H, E), k), "whh_b": u(keys[5], (4 * H, H), k),
        "bih_b": u(keys[6], (4 * H,), k),   "bhh_b": u(keys[7], (4 * H,), k),
    }
    kl = 1.0 / np.sqrt(2 * H)
    p["wl"] = u(keys[8], (L, 2 * H), kl)
    p["bl"] = u(keys[9], (L,), kl)
    return p


def prepare_kernel_params(raw):
    """Repack PyTorch-layout weights into ONE packed kernel buffer (done once).

    Row layout (all starts multiples of 8, lane offsets multiples of 128):
      rows [0, E):            x-projection RHS (E, 8H)  = [fwd i|f|g|o , bwd i|f|g|o]
      rows [r_whh, +H):       recurrent RHS    (H, 4H)  = fwd i|f|g|o
      rows [r_wl, +2H):       hidden2label     (2H, LP) (label dim padded to 128k)
      row   r_bias:           combined gate bias (b_ih + b_hh), fwd|bwd
      row   r_bias+1:         label bias, padded lanes = -1e30 (vanish in LSE)
    whh_b is not needed: the backward step starts from the zero state.
    """
    fourH, E = raw["wih_f"].shape
    H = fourH // 4
    L = raw["bl"].shape[0]
    lay = _layout(E, H, L)
    G, LP = lay["G"], lay["LP"]

    # PyTorch gate order along rows of w_ih/w_hh is i, f, g, o -> transpose
    # puts the gates as 4H lane-packed columns.
    wx = jnp.concatenate([raw["wih_f"].T, raw["wih_b"].T], axis=1)        # (E, 2G)
    bx = jnp.concatenate([raw["bih_f"] + raw["bhh_f"],
                          raw["bih_b"] + raw["bhh_b"]])                   # (2G,)
    whh = raw["whh_f"].T                                                  # (H, G)
    wl = jnp.zeros((2 * H, LP), jnp.float32).at[:, :L].set(raw["wl"].T)   # (2H, LP)
    bl = jnp.full((LP,), -1e30, jnp.float32).at[:L].set(raw["bl"])        # (LP,)

    wbuf = jnp.zeros((lay["n_rows"], lay["width"]), jnp.float32)
    wbuf = wbuf.at[0:E, 0:2 * G].set(wx)
    wbuf = wbuf.at[lay["r_whh"]:lay["r_whh"] + H, 0:G].set(whh)
    wbuf = wbuf.at[lay["r_wl"]:lay["r_wl"] + 2 * H, 0:LP].set(wl)
    wbuf = wbuf.at[lay["r_bias"], 0:2 * G].set(bx)
    wbuf = wbuf.at[lay["r_bias"] + 1, 0:LP].set(bl)
    return wbuf


def reference_forward(x, raw):
    """Pure-JAX replica of the PyTorch module forward."""
    T, B, E = x.shape
    H = raw["whh_f"].shape[1]

    def cell(x_t, h, c, wih, whh, bih, bhh):
        gates = x_t @ wih.T + h @ whh.T + bih + bhh
        i, f, g, o = jnp.split(gates, 4, axis=-1)
        c_new = jax.nn.sigmoid(f) * c + jax.nn.sigmoid(i) * jnp.tanh(g)
        h_new = jax.nn.sigmoid(o) * jnp.tanh(c_new)
        return h_new, c_new

    h = jnp.zeros((B, H), jnp.float32)
    c = jnp.zeros((B, H), jnp.float32)
    for t in range(T):
        h, c = cell(x[t], h, c, raw["wih_f"], raw["whh_f"], raw["bih_f"], raw["bhh_f"])
    zeros = jnp.zeros((B, H), jnp.float32)
    h_b, _ = cell(x[T - 1], zeros, zeros,
                  raw["wih_b"], raw["whh_b"], raw["bih_b"], raw["bhh_b"])
    y = jnp.concatenate([h, h_b], axis=-1) @ raw["wl"].T + raw["bl"]
    return jax.nn.log_softmax(y, axis=-1)


if __name__ == "__main__":
    # Small shapes implied by the module: seq=8, batch=2, embedding_dim=16,
    # hidden_dim=32, label_size=3.
    T, B, E, H, L = 8, 2, 16, 32, 3

    key = jax.random.PRNGKey(0)
    k_x, k_p = jax.random.split(key)
    x = jax.random.normal(k_x, (T, B, E), jnp.float32)

    raw = init_params(k_p, E, H, L)
    wbuf = prepare_kernel_params(raw)

    out = bilstm_sentiment_forward(x, wbuf, hidden_dim=H, label_size=L)
    out = jax.block_until_ready(out)

    ref = reference_forward(x, raw)
    np.testing.assert_allclose(np.asarray(out), np.asarray(ref), rtol=1e-4, atol=1e-5)

    print("KERNEL_OK")
</pallas_src>

<mosaic_0001>
module attributes {stable_mosaic.version = 11 : i64} {
  func.func @bilstm_sentiment_kernel(%arg0: memref<64x16xf32, #tpu.memory_space<vmem>>, %arg1: memref<120x256xf32, #tpu.memory_space<vmem>>, %arg2: memref<8x128xf32, #tpu.memory_space<vmem>>) attributes {dimension_semantics = [], scalar_prefetch = 0 : i64, scratch_operands = 0 : i64, tpu.core_type = #tpu.core_type<tc>} {
    %c0 = arith.constant 0 : index
    %c0_0 = arith.constant 0 : index
    %0 = vector.load %arg0[%c0, %c0_0] : memref<64x16xf32, #tpu.memory_space<vmem>>, vector<64x16xf32>
    %c0_1 = arith.constant 0 : index
    %c0_2 = arith.constant 0 : index
    %1 = vector.load %arg1[%c0_1, %c0_2] : memref<120x256xf32, #tpu.memory_space<vmem>>, vector<16x256xf32>
    %c16 = arith.constant 16 : index
    %c0_3 = arith.constant 0 : index
    %2 = vector.load %arg1[%c16, %c0_3] : memref<120x256xf32, #tpu.memory_space<vmem>>, vector<32x128xf32>
    %c48 = arith.constant 48 : index
    %c0_4 = arith.constant 0 : index
    %3 = vector.load %arg1[%c48, %c0_4] : memref<120x256xf32, #tpu.memory_space<vmem>>, vector<64x128xf32>
    %c112 = arith.constant 112 : index
    %c0_5 = arith.constant 0 : index
    %4 = vector.load %arg1[%c112, %c0_5] : memref<120x256xf32, #tpu.memory_space<vmem>>, vector<1x256xf32>
    %c113 = arith.constant 113 : index
    %c0_6 = arith.constant 0 : index
    %5 = vector.load %arg1[%c113, %c0_6] : memref<120x256xf32, #tpu.memory_space<vmem>>, vector<1x128xf32>
    %cst = arith.constant dense<0.000000e+00> : vector<64x256xf32>
    %6 = tpu.matmul %0, %1, %cst {dimension_numbers = #tpu.dot_dimension_numbers<[1], [0], [0], [1], [0, 0, 1, 1], [], []>} : vector<64x16xf32>, vector<16x256xf32>, vector<64x256xf32> -> vector<64x256xf32>
    %7 = vector.broadcast %4 : vector<1x256xf32> to vector<64x256xf32>
    %8 = arith.addf %6, %7 : vector<64x256xf32>
    %cst_7 = arith.constant 0.000000e+00 : f32
    %9 = vector.broadcast %cst_7 : f32 to vector<8x32xf32>
    %cst_8 = arith.constant 0.000000e+00 : f32
    %10 = vector.broadcast %cst_8 : f32 to vector<8x32xf32>
    %11 = vector.extract_strided_slice %8 {offsets = [0, 0], sizes = [8, 128], strides = [1, 1]} : vector<64x256xf32> to vector<8x128xf32>
    %cst_9 = arith.constant dense<0.000000e+00> : vector<8x128xf32>
    %12 = tpu.matmul %9, %2, %cst_9 {dimension_numbers = #tpu.dot_dimension_numbers<[1], [0], [0], [1], [0, 0, 1, 1], [], []>} : vector<8x32xf32>, vector<32x128xf32>, vector<8x128xf32> -> vector<8x128xf32>
    %13 = arith.addf %11, %12 : vector<8x128xf32>
    %14 = arith.negf %13 : vector<8x128xf32>
    %15 = math.exp %14 : vector<8x128xf32>
    %cst_10 = arith.constant 1.000000e+00 : f32
    %16 = vector.broadcast %cst_10 : f32 to vector<8x128xf32>
    %17 = arith.addf %16, %15 : vector<8x128xf32>
    %18 = arith.divf %16, %17 : vector<8x128xf32>
    %19 = vector.extract_strided_slice %13 {offsets = [0, 64], sizes = [8, 32], strides = [1, 1]} : vector<8x128xf32> to vector<8x32xf32>
    %20 = math.tanh %19 : vector<8x32xf32>
    %21 = vector.extract_strided_slice %18 {offsets = [0, 32], sizes = [8, 32], strides = [1, 1]} : vector<8x128xf32> to vector<8x32xf32>
    %22 = arith.mulf %21, %10 : vector<8x32xf32>
    %23 = vector.extract_strided_slice %18 {offsets = [0, 0], sizes = [8, 32], strides = [1, 1]} : vector<8x128xf32> to vector<8x32xf32>
    %24 = arith.mulf %23, %20 : vector<8x32xf32>
    %25 = arith.addf %22, %24 : vector<8x32xf32>
    %26 = vector.extract_strided_slice %18 {offsets = [0, 96], sizes = [8, 32], strides = [1, 1]} : vector<8x128xf32> to vector<8x32xf32>
    %27 = math.tanh %25 : vector<8x32xf32>
    %28 = arith.mulf %26, %27 : vector<8x32xf32>
    %29 = vector.extract_strided_slice %8 {offsets = [8, 0], sizes = [8, 128], strides = [1, 1]} : vector<64x256xf32> to vector<8x128xf32>
    %cst_11 = arith.constant dense<0.000000e+00> : vector<8x128xf32>
    %30 = tpu.matmul %28, %2, %cst_11 {dimension_numbers = #tpu.dot_dimension_numbers<[1], [0], [0], [1], [0, 0, 1, 1], [], []>} : vector<8x32xf32>, vector<32x128xf32>, vector<8x128xf32> -> vector<8x128xf32>
    %31 = arith.addf %29, %30 : vector<8x128xf32>
    %32 = arith.negf %31 : vector<8x128xf32>
    %33 = math.exp %32 : vector<8x128xf32>
    %cst_12 = arith.constant 1.000000e+00 : f32
    %34 = vector.broadcast %cst_12 : f32 to vector<8x128xf32>
    %35 = arith.addf %34, %33 : vector<8x128xf32>
    %36 = arith.divf %34, %35 : vector<8x128xf32>
    %37 = vector.extract_strided_slice %31 {offsets = [0, 64], sizes = [8, 32], strides = [1, 1]} : vector<8x128xf32> to vector<8x32xf32>
    %38 = math.tanh %37 : vector<8x32xf32>
    %39 = vector.extract_strided_slice %36 {offsets = [0, 32], sizes = [8, 32], strides = [1, 1]} : vector<8x128xf32> to vector<8x32xf32>
    %40 = arith.mulf %39, %25 : vector<8x32xf32>
    %41 = vector.extract_strided_slice %36 {offsets = [0, 0], sizes = [8, 32], strides = [1, 1]} : vector<8x128xf32> to vector<8x32xf32>
    %42 = arith.mulf %41, %38 : vector<8x32xf32>
    %43 = arith.addf %40, %42 : vector<8x32xf32>
    %44 = vector.extract_strided_slice %36 {offsets = [0, 96], sizes = [8, 32], strides = [1, 1]} : vector<8x128xf32> to vector<8x32xf32>
    %45 = math.tanh %43 : vector<8x32xf32>
    %46 = arith.mulf %44, %45 : vector<8x32xf32>
    %47 = vector.extract_strided_slice %8 {offsets = [16, 0], sizes = [8, 128], strides = [1, 1]} : vector<64x256xf32> to vector<8x128xf32>
    %cst_13 = arith.constant dense<0.000000e+00> : vector<8x128xf32>
    %48 = tpu.matmul %46, %2, %cst_13 {dimension_numbers = #tpu.dot_dimension_numbers<[1], [0], [0], [1], [0, 0, 1, 1], [], []>} : vector<8x32xf32>, vector<32x128xf32>, vector<8x128xf32> -> vector<8x128xf32>
    %49 = arith.addf %47, %48 : vector<8x128xf32>
    %50 = arith.negf %49 : vector<8x128xf32>
    %51 = math.exp %50 : vector<8x128xf32>
    %cst_14 = arith.constant 1.000000e+00 : f32
    %52 = vector.broadcast %cst_14 : f32 to vector<8x128xf32>
    %53 = arith.addf %52, %51 : vector<8x128xf32>
    %54 = arith.divf %52, %53 : vector<8x128xf32>
    %55 = vector.extract_strided_slice %49 {offsets = [0, 64], sizes = [8, 32], strides = [1, 1]} : vector<8x128xf32> to vector<8x32xf32>
    %56 = math.tanh %55 : vector<8x32xf32>
    %57 = vector.extract_strided_slice %54 {offsets = [0, 32], sizes = [8, 32], strides = [1, 1]} : vector<8x128xf32> to vector<8x32xf32>
    %58 = arith.mulf %57, %43 : vector<8x32xf32>
    %59 = vector.extract_strided_slice %54 {offsets = [0, 0], sizes = [8, 32], strides = [1, 1]} : vector<8x128xf32> to vector<8x32xf32>
    %60 = arith.mulf %59, %56 : vector<8x32xf32>
    %61 = arith.addf %58, %60 : vector<8x32xf32>
    %62 = vector.extract_strided_slice %54 {offsets = [0, 96], sizes = [8, 32], strides = [1, 1]} : vector<8x128xf32> to vector<8x32xf32>
    %63 = math.tanh %61 : vector<8x32xf32>
    %64 = arith.mulf %62, %63 : vector<8x32xf32>
    %65 = vector.extract_strided_slice %8 {offsets = [24, 0], sizes = [8, 128], strides = [1, 1]} : vector<64x256xf32> to vector<8x128xf32>
    %cst_15 = arith.constant dense<0.000000e+00> : vector<8x128xf32>
    %66 = tpu.matmul %64, %2, %cst_15 {dimension_numbers = #tpu.dot_dimension_numbers<[1], [0], [0], [1], [0, 0, 1, 1], [], []>} : vector<8x32xf32>, vector<32x128xf32>, vector<8x128xf32> -> vector<8x128xf32>
    %67 = arith.addf %65, %66 : vector<8x128xf32>
    %68 = arith.negf %67 : vector<8x128xf32>
    %69 = math.exp %68 : vector<8x128xf32>
    %cst_16 = arith.constant 1.000000e+00 : f32
    %70 = vector.broadcast %cst_16 : f32 to vector<8x128xf32>
    %71 = arith.addf %70, %69 : vector<8x128xf32>
    %72 = arith.divf %70, %71 : vector<8x128xf32>
    %73 = vector.extract_strided_slice %67 {offsets = [0, 64], sizes = [8, 32], strides = [1, 1]} : vector<8x128xf32> to vector<8x32xf32>
    %74 = math.tanh %73 : vector<8x32xf32>
    %75 = vector.extract_strided_slice %72 {offsets = [0, 32], sizes = [8, 32], strides = [1, 1]} : vector<8x128xf32> to vector<8x32xf32>
    %76 = arith.mulf %75, %61 : vector<8x32xf32>
    %77 = vector.extract_strided_slice %72 {offsets = [0, 0], sizes = [8, 32], strides = [1, 1]} : vector<8x128xf32> to vector<8x32xf32>
    %78 = arith.mulf %77, %74 : vector<8x32xf32>
    %79 = arith.addf %76, %78 : vector<8x32xf32>
    %80 = vector.extract_strided_slice %72 {offsets = [0, 96], sizes = [8, 32], strides = [1, 1]} : vector<8x128xf32> to vector<8x32xf32>
    %81 = math.tanh %79 : vector<8x32xf32>
    %82 = arith.mulf %80, %81 : vector<8x32xf32>
    %83 = vector.extract_strided_slice %8 {offsets = [32, 0], sizes = [8, 128], strides = [1, 1]} : vector<64x256xf32> to vector<8x128xf32>
    %cst_17 = arith.constant dense<0.000000e+00> : vector<8x128xf32>
    %84 = tpu.matmul %82, %2, %cst_17 {dimension_numbers = #tpu.dot_dimension_numbers<[1], [0], [0], [1], [0, 0, 1, 1], [], []>} : vector<8x32xf32>, vector<32x128xf32>, vector<8x128xf32> -> vector<8x128xf32>
    %85 = arith.addf %83, %84 : vector<8x128xf32>
    %86 = arith.negf %85 : vector<8x128xf32>
    %87 = math.exp %86 : vector<8x128xf32>
    %cst_18 = arith.constant 1.000000e+00 : f32
    %88 = vector.broadcast %cst_18 : f32 to vector<8x128xf32>
    %89 = arith.addf %88, %87 : vector<8x128xf32>
    %90 = arith.divf %88, %89 : vector<8x128xf32>
    %91 = vector.extract_strided_slice %85 {offsets = [0, 64], sizes = [8, 32], strides = [1, 1]} : vector<8x128xf32> to vector<8x32xf32>
    %92 = math.tanh %91 : vector<8x32xf32>
    %93 = vector.extract_strided_slice %90 {offsets = [0, 32], sizes = [8, 32], strides = [1, 1]} : vector<8x128xf32> to vector<8x32xf32>
    %94 = arith.mulf %93, %79 : vector<8x32xf32>
    %95 = vector.extract_strided_slice %90 {offsets = [0, 0], sizes = [8, 32], strides = [1, 1]} : vector<8x128xf32> to vector<8x32xf32>
    %96 = arith.mulf %95, %92 : vector<8x32xf32>
    %97 = arith.addf %94, %96 : vector<8x32xf32>
    %98 = vector.extract_strided_slice %90 {offsets = [0, 96], sizes = [8, 32], strides = [1, 1]} : vector<8x128xf32> to vector<8x32xf32>
    %99 = math.tanh %97 : vector<8x32xf32>
    %100 = arith.mulf %98, %99 : vector<8x32xf32>
    %101 = vector.extract_strided_slice %8 {offsets = [40, 0], sizes = [8, 128], strides = [1, 1]} : vector<64x256xf32> to vector<8x128xf32>
    %cst_19 = arith.constant dense<0.000000e+00> : vector<8x128xf32>
    %102 = tpu.matmul %100, %2, %cst_19 {dimension_numbers = #tpu.dot_dimension_numbers<[1], [0], [0], [1], [0, 0, 1, 1], [], []>} : vector<8x32xf32>, vector<32x128xf32>, vector<8x128xf32> -> vector<8x128xf32>
    %103 = arith.addf %101, %102 : vector<8x128xf32>
    %104 = arith.negf %103 : vector<8x128xf32>
    %105 = math.exp %104 : vector<8x128xf32>
    %cst_20 = arith.constant 1.000000e+00 : f32
    %106 = vector.broadcast %cst_20 : f32 to vector<8x128xf32>
    %107 = arith.addf %106, %105 : vector<8x128xf32>
    %108 = arith.divf %106, %107 : vector<8x128xf32>
    %109 = vector.extract_strided_slice %103 {offsets = [0, 64], sizes = [8, 32], strides = [1, 1]} : vector<8x128xf32> to vector<8x32xf32>
    %110 = math.tanh %109 : vector<8x32xf32>
    %111 = vector.extract_strided_slice %108 {offsets = [0, 32], sizes = [8, 32], strides = [1, 1]} : vector<8x128xf32> to vector<8x32xf32>
    %112 = arith.mulf %111, %97 : vector<8x32xf32>
    %113 = vector.extract_strided_slice %108 {offsets = [0, 0], sizes = [8, 32], strides = [1, 1]} : vector<8x128xf32> to vector<8x32xf32>
    %114 = arith.mulf %113, %110 : vector<8x32xf32>
    %115 = arith.addf %112, %114 : vector<8x32xf32>
    %116 = vector.extract_strided_slice %108 {offsets = [0, 96], sizes = [8, 32], strides = [1, 1]} : vector<8x128xf32> to vector<8x32xf32>
    %117 = math.tanh %115 : vector<8x32xf32>
    %118 = arith.mulf %116, %117 : vector<8x32xf32>
    %119 = vector.extract_strided_slice %8 {offsets = [48, 0], sizes = [8, 128], strides = [1, 1]} : vector<64x256xf32> to vector<8x128xf32>
    %cst_21 = arith.constant dense<0.000000e+00> : vector<8x128xf32>
    %120 = tpu.matmul %118, %2, %cst_21 {dimension_numbers = #tpu.dot_dimension_numbers<[1], [0], [0], [1], [0, 0, 1, 1], [], []>} : vector<8x32xf32>, vector<32x128xf32>, vector<8x128xf32> -> vector<8x128xf32>
    %121 = arith.addf %119, %120 : vector<8x128xf32>
    %122 = arith.negf %121 : vector<8x128xf32>
    %123 = math.exp %122 : vector<8x128xf32>
    %cst_22 = arith.constant 1.000000e+00 : f32
    %124 = vector.broadcast %cst_22 : f32 to vector<8x128xf32>
    %125 = arith.addf %124, %123 : vector<8x128xf32>
    %126 = arith.divf %124, %125 : vector<8x128xf32>
    %127 = vector.extract_strided_slice %121 {offsets = [0, 64], sizes = [8, 32], strides = [1, 1]} : vector<8x128xf32> to vector<8x32xf32>
    %128 = math.tanh %127 : vector<8x32xf32>
    %129 = vector.extract_strided_slice %126 {offsets = [0, 32], sizes = [8, 32], strides = [1, 1]} : vector<8x128xf32> to vector<8x32xf32>
    %130 = arith.mulf %129, %115 : vector<8x32xf32>
    %131 = vector.extract_strided_slice %126 {offsets = [0, 0], sizes = [8, 32], strides = [1, 1]} : vector<8x128xf32> to vector<8x32xf32>
    %132 = arith.mulf %131, %128 : vector<8x32xf32>
    %133 = arith.addf %130, %132 : vector<8x32xf32>
    %134 = vector.extract_strided_slice %126 {offsets = [0, 96], sizes = [8, 32], strides = [1, 1]} : vector<8x128xf32> to vector<8x32xf32>
    %135 = math.tanh %133 : vector<8x32xf32>
    %136 = arith.mulf %134, %135 : vector<8x32xf32>
    %137 = vector.extract_strided_slice %8 {offsets = [56, 0], sizes = [8, 128], strides = [1, 1]} : vector<64x256xf32> to vector<8x128xf32>
    %cst_23 = arith.constant dense<0.000000e+00> : vector<8x128xf32>
    %138 = tpu.matmul %136, %2, %cst_23 {dimension_numbers = #tpu.dot_dimension_numbers<[1], [0], [0], [1], [0, 0, 1, 1], [], []>} : vector<8x32xf32>, vector<32x128xf32>, vector<8x128xf32> -> vector<8x128xf32>
    %139 = arith.addf %137, %138 : vector<8x128xf32>
    %140 = arith.negf %139 : vector<8x128xf32>
    %141 = math.exp %140 : vector<8x128xf32>
    %cst_24 = arith.constant 1.000000e+00 : f32
    %142 = vector.broadcast %cst_24 : f32 to vector<8x128xf32>
    %143 = arith.addf %142, %141 : vector<8x128xf32>
    %144 = arith.divf %142, %143 : vector<8x128xf32>
    %145 = vector.extract_strided_slice %139 {offsets = [0, 64], sizes = [8, 32], strides = [1, 1]} : vector<8x128xf32> to vector<8x32xf32>
    %146 = math.tanh %145 : vector<8x32xf32>
    %147 = vector.extract_strided_slice %144 {offsets = [0, 32], sizes = [8, 32], strides = [1, 1]} : vector<8x128xf32> to vector<8x32xf32>
    %148 = arith.mulf %147, %133 : vector<8x32xf32>
    %149 = vector.extract_strided_slice %144 {offsets = [0, 0], sizes = [8, 32], strides = [1, 1]} : vector<8x128xf32> to vector<8x32xf32>
    %150 = arith.mulf %149, %146 : vector<8x32xf32>
    %151 = arith.addf %148, %150 : vector<8x32xf32>
    %152 = vector.extract_strided_slice %144 {offsets = [0, 96], sizes = [8, 32], strides = [1, 1]} : vector<8x128xf32> to vector<8x32xf32>
    %153 = math.tanh %151 : vector<8x32xf32>
    %154 = arith.mulf %152, %153 : vector<8x32xf32>
    %155 = vector.extract_strided_slice %8 {offsets = [56, 128], sizes = [8, 128], strides = [1, 1]} : vector<64x256xf32> to vector<8x128xf32>
    %156 = arith.negf %155 : vector<8x128xf32>
    %157 = math.exp %156 : vector<8x128xf32>
    %cst_25 = arith.constant 1.000000e+00 : f32
    %158 = vector.broadcast %cst_25 : f32 to vector<8x128xf32>
    %159 = arith.addf %158, %157 : vector<8x128xf32>
    %160 = arith.divf %158, %159 : vector<8x128xf32>
    %161 = vector.extract_strided_slice %160 {offsets = [0, 96], sizes = [8, 32], strides = [1, 1]} : vector<8x128xf32> to vector<8x32xf32>
    %162 = vector.extract_strided_slice %160 {offsets = [0, 0], sizes = [8, 32], strides = [1, 1]} : vector<8x128xf32> to vector<8x32xf32>
    %163 = vector.extract_strided_slice %155 {offsets = [0, 64], sizes = [8, 32], strides = [1, 1]} : vector<8x128xf32> to vector<8x32xf32>
    %164 = math.tanh %163 : vector<8x32xf32>
    %165 = arith.mulf %162, %164 : vector<8x32xf32>
    %166 = math.tanh %165 : vector<8x32xf32>
    %167 = arith.mulf %161, %166 : vector<8x32xf32>
    %168 = tpu.concatenate %154, %167 in 1 : vector<8x32xf32>, vector<8x32xf32> -> vector<8x64xf32>
    %cst_26 = arith.constant dense<0.000000e+00> : vector<8x128xf32>
    %169 = tpu.matmul %168, %3, %cst_26 {dimension_numbers = #tpu.dot_dimension_numbers<[1], [0], [0], [1], [0, 0, 1, 1], [], []>} : vector<8x64xf32>, vector<64x128xf32>, vector<8x128xf32> -> vector<8x128xf32>
    %170 = vector.broadcast %5 : vector<1x128xf32> to vector<8x128xf32>
    %171 = arith.addf %169, %170 : vector<8x128xf32>
    %cst_27 = arith.constant dense<0xFF800000> : vector<8xf32>
    %172 = vector.multi_reduction <maximumf>, %171, %cst_27 [1] : vector<8x128xf32> to vector<8xf32>
    %173 = vector.shape_cast %172 : vector<8xf32> to vector<8x1xf32>
    %174 = vector.broadcast %173 : vector<8x1xf32> to vector<8x128xf32>
    %175 = arith.subf %171, %174 : vector<8x128xf32>
    %176 = math.exp %175 : vector<8x128xf32>
    %cst_28 = arith.constant dense<0.000000e+00> : vector<8xf32>
    %177 = vector.multi_reduction <add>, %176, %cst_28 [1] : vector<8x128xf32> to vector<8xf32>
    %178 = vector.shape_cast %177 : vector<8xf32> to vector<8x1xf32>
    %179 = math.log %178 : vector<8x1xf32>
    %180 = arith.addf %179, %173 : vector<8x1xf32>
    %181 = vector.broadcast %180 : vector<8x1xf32> to vector<8x128xf32>
    %182 = arith.subf %171, %181 : vector<8x128xf32>
    %c0_29 = arith.constant 0 : index
    %c0_30 = arith.constant 0 : index
    %183 = vector.load %arg2[%c0_29, %c0_30] : memref<8x128xf32, #tpu.memory_space<vmem>>, vector<8x128xf32>
    tpu.vector_store %arg2[%c0_29, %c0_30], %182 {strides = array<i32>} : memref<8x128xf32, #tpu.memory_space<vmem>>, vector<8x128xf32>,
    return
  }
}

</mosaic_0001>

<bundles_post_ra>
// kernel: bilstm_sentiment_forward.1
= control target key start
LH: loop header
LB: loop body
LE: loop exit
PB: predicated region body
PF: predicated region fallthrough
CT: control target
= control target key end

     0   :  { %7 = vsyncpa [#allocation3], 0  ;;  %s1402_s9 = smov [#allocation2]   ;;  %s1639_s0 = inlined_call_operand.vmem [shape: f32[64,16], index: 0, kind: input, shape index: {}]   ;;  %s1640_s1 = inlined_call_operand.hbm [shape: f32[120,256], index: 1, kind: input, shape index: {}]   ;;  %s1641_s2 = inlined_call_operand.vmem [shape: f32[8,128], index: 2, kind: output, shape index: {}]  }
   0x1   :  { %s15_s10 = sshll.u32 %s1402_s9, 4  ;;  %s16_s10 = int_to_ptr.vmem [resolvable:$true] %s15_s10 }
   0x2   :  { %s1388_s11 = scalar_lea.vmem %s16_s10, 3840  ;;  %p1393_p1 = scmp.lt.s32.totalorder %s16_s10, %s16_s10 }
   0x3   :  { %p1389_p0 = scmp.ne.s32.totalorder %s16_s10, %s1388_s11  ;;  %p1394_p2 = scmp.lt.s32.totalorder %s1388_s11, %s1388_s11 }
   0x5   :  { %p1395_p3 = por %p1394_p2, %p1393_p1 }
   0x7   :  { %p1396_p4 = pnand %p1395_p3, %p1389_p0 }
   0x9   :  { %1399 = shalt.err (!%p1396_p4)
}
   0xa   :  { %s1403_s12 = smov 256   ;;  %s1404_s13 = smov 16  }
   0xb   :  { %21 = dma.hbm_to_vmem [thread:$0]  %s1640_s1, 3840, %s16_s10, [#allocation3], %s1403_s12, %s1403_s12, %s1404_s13  }
   0xc   :  { %1400 = dma.done.wait [#allocation3], 3840  }
   0xd   :  { %1401 = vsyncadd [#allocation3], 4294963456  ;;  %v1405_v0 = vmov 0.0   ;;  %v36_v1 = vld [vmem:[#allocation2 + $0x18] sm:$0xff]  ;;  %v35_v2 = vld [vmem:[#allocation2 + $0x10] sm:$0xff]  ;;  %vm63_vm0 = vcmask 130048   ;;  %v53_v12 = vlaneseq }
   0xe   :  { %182 = vmatprep.mubr.f32.mxu1 %v1405_v0  ;;  %152 = vmatprep.mubr.f32.mxu0 %v1405_v0  ;;  %v34_v3 = vld [vmem:[#allocation2 + $0x8] sm:$0xff]  ;;  %v33_v4 = vld [vmem:[#allocation2] sm:$0xff]  ;;  %v31_v5 = vld [vmem:[%s1639_s0 + $0x30] sm:$0xff]  ;;  %vm1406_vm1 = vmmov 0   ;;  %s1407_s21 = smov 64   ;;  %s1408_s22 = smov 32  }
   0xf   :  { %1292 = vmatprep.subr.mxu1 %v36_v1  ;;  %116 = vmatprep.subr.mxu0 %v36_v1  ;;  %v1433_v6 = vld [vmem:[#allocation2 + $0x50] sm:$0xff]  ;;  %v25_v7 = vld [vmem:[%s1639_s0] sm:$0xff]  ;;  %v32_v9 = vld [vmem:[%s1639_s0 + $0x38] sm:$0xff]  ;;  %v1483_v13 = vshrl.u32 %v53_v12, 7  ;;  %vm194_vm2 = vcmask 261120   ;;  %vm1020_vm3 = vcmask 523264  }
  0x10   :  { %1294 = vmatpush1.msra.mxu1 %v35_v2  ;;  %117 = vmatpush1.msra.mxu0 %v35_v2  ;;  %v1440_v8 = vld [vmem:[#allocation2 + $0x40] sm:$0xff]  ;;  %v1449_v10 = vld [vmem:[#allocation2 + $0x30] sm:$0xff]  ;;  %v26_v37 = vld [vmem:[%s1639_s0 + $0x8] sm:$0xff] }
  0x11   :  { %1293 = vmatprep.subr.mxu1 %v34_v3  ;;  %118 = vmatprep.subr.mxu0 %v34_v3  ;;  %v1455_v11 = vld [vmem:[#allocation2 + $0x20] sm:$0xff]  ;;  %v55_v14 = vsub.s32 0, %v1483_v13  ;;  %v27_v58 = vld [vmem:[%s1639_s0 + $0x10] sm:$0xff] }
  0x12   :  { %1295 = vmatpush1.msra.mxu1 %v33_v4  ;;  %119 = vmatpush1.msra.mxu0 %v33_v4  ;;  %v1486_v15 = vld [vmem:[#allocation2 + $0xe0] ss:$8 sm:$0x3] }
  0x13   :  { %1117 = vmatmul.mubr.msk.f32.vlgmr.msra.gmra.mxu1 %vm63_vm0, %v31_v5  ;;  %1185 = vmatprep.subr.mxu1 %v1405_v0  ;;  %v1491_v19 = vrot.slane %v1486_v15, %v55_v14 }
  0x14   :  { %1186 = vmatpush3.msra.mxu1 %v1433_v6  ;;  %187 = vmatprep.mubr.f32.mxu1 %v1405_v0 }
  0x15   :  { %1187 = vmatprep.subr.mxu1 %v1405_v0  ;;  %1111 = vmatmul.mubr.msk.f32.vlgmr.msra.gmra.mxu0 %vm63_vm0, %v25_v7 }
  0x16   :  { %1188 = vmatpush3.msra.mxu1 %v1440_v8  ;;  %157 = vmatprep.mubr.f32.mxu0 %v1405_v0 }
  0x17   :  { %1118 = vmatmul.mubr.msk.f32.gmra.mxu1 %vm63_vm0, %v32_v9  ;;  %1189 = vmatprep.subr.mxu1 %v1405_v0 }
  0x18   :  { %1190 = vmatpush3.msra.mxu1 %v1449_v10  ;;  %1193 = vmatprep.mubr.msk.f32.mxu1 %vm1406_vm1, %v1405_v0 }
  0x19   :  { %1191 = vmatprep.subr.mxu1 %v1405_v0  ;;  %1229 = vmatprep.subr.mxu0 %v1405_v0 }
  0x1a   :  { %1192 = vmatpush3.msra.mxu1 %v1455_v11  ;;  %1230 = vmatpush3.msra.mxu0 %v1433_v6 }
  0x1b   :  { %1194 = vmatmul.mubr.f32.vlgmr.msra.gmra.mxu1 %v1405_v0  ;;  %1196 = vmatprep.subr.mxu1 %v1405_v0 }
  0x1c   :  { %1197 = vmatpush3.msra.mxu1 %v1433_v6  ;;  %1204 = vmatprep.mubr.msk.f32.mxu1 %vm1406_vm1, %v1405_v0 }
  0x1d   :  { %1198 = vmatprep.subr.mxu1 %v1405_v0  ;;  %1231 = vmatprep.subr.mxu0 %v1405_v0 }
  0x1e   :  { %1199 = vmatpush3.msra.mxu1 %v1440_v8  ;;  %1232 = vmatpush3.msra.mxu0 %v1440_v8 }
  0x1f   :  { %1200 = vmatprep.subr.mxu1 %v1405_v0  ;;  %1233 = vmatprep.subr.mxu0 %v1405_v0 }
  0x20   :  { %1201 = vmatpush3.msra.mxu1 %v1449_v10  ;;  %1234 = vmatpush3.msra.mxu0 %v1449_v10 }
  0x21   :  { %1202 = vmatprep.subr.mxu1 %v1405_v0  ;;  %1235 = vmatprep.subr.mxu0 %v1405_v0 }
  0x22   :  { %1203 = vmatpush3.msra.mxu1 %v1455_v11  ;;  %1236 = vmatpush3.msra.mxu0 %v1455_v11 }
  0x23   :  { %1207 = vmatprep.subr.mxu1 %v1405_v0  ;;  %1251 = vmatprep.subr.mxu0 %v1405_v0 }
  0x24   :  { %1112 = vmatmul.mubr.msk.f32.gmra.mxu0 %vm63_vm0, %v26_v37 }
  0x25   :  { %162 = vmatprep.mubr.f32.mxu0 %v1405_v0 }
  0x28   :  { %1113 = vmatmul.mubr.msk.f32.gmra.mxu0 %vm63_vm0, %v27_v58 }
  0x29   :  { %167 = vmatprep.mubr.f32.mxu0 %v1405_v0 }
  0xd3   :  { %v1488_v16 = vpop.f32.mrf.mxu1 }
  0xd5   :  { %v186_v17 = vpop.f32.mrf.mxu1  ;;  %v154_v18 = vpop.f32.mrf.mxu0 }
  0xd6   :  { %v155_v22 = vadd.f32 %v154_v18, %v1491_v19 }
  0xd7   :  { %v1493_v20 = vpop.f32.mrf.mxu1  ;;  %v156_v21 = vpop.f32.mrf.mxu0 }
  0xd9   :  { %v1496_v23 = vpop.f32.mrf.mxu1 }
  0xdb   :  { %v264_v24 = vpop.f32.mrf.mxu1 }
  0xdc   :  { %v268_v25 = vadd.f32 %v264_v24, %v155_v22 }
  0xdd   :  { %v1195_v26 = vpop.f32.mrf.mxu1 }
  0xde   :  { %1304 = vtanh.f32 %v268_v25  ;;  %v1119_v28 = vmul.f32 -1.442695, %v268_v25  ;;  %v28_v26 = vld [vmem:[%s1639_s0 + $0x18] sm:$0xff] }
  0xdf   :  { %1114 = vmatmul.mubr.msk.f32.gmra.mxu0 %vm63_vm0, %v28_v26 }
  0xe0   :  { %1306 = vpow2.f32 %v1119_v28  ;;  %172 = vmatprep.mubr.f32.mxu0 %v1405_v0 }
  0xe4   :  { %v159_v41 = vpop.f32.mrf.mxu0 }
  0xe5   :  { %v160_v44 = vadd.f32 %v159_v41, %v1491_v19 }
  0xe6   :  { %v161_v42 = vpop.f32.mrf.mxu0 }
  0xe8   :  { %v164_v62 = vpop.f32.mrf.mxu0 }
  0xe9   :  { %v165_v2 = vadd.f32 %v164_v62, %v1491_v19 }
  0xea   :  { %v166_v63 = vpop.f32.mrf.mxu0 }
  0xeb   :  { %v1305_v27 = vpop.eup %1304 }
  0xec   :  { %278 = vrot.lane.b32.xlu0 %v1305_v27, %s1407_s21 }
  0xed   :  { %v1307_v29 = vpop.eup %1306 }
  0xee   :  { %v272_v30 = vadd.f32 1.0, %v1307_v29 }
  0xf0   :  { %1308 = vrcp.f32 %v272_v30 }
  0xfd   :  { %v1309_v31 = vpop.eup %1308 }
  0xfe   :  { %v276_v34 = vmul.f32 0.0, %v1309_v31 }
 0x15e   :  { %v279_v32 = vpop.permute.xlu0 %278 }
 0x15f   :  { %v281_v33 = vmul.f32 %v1309_v31, %v279_v32 }
 0x161   :  { %283 = vrot.lane.b32.xlu0 %v281_v33, %s1408_s22 }
 0x19f   :  { %v169_v30 = vpop.f32.mrf.mxu0 }
 0x1a0   :  { %v170_v33 = vadd.f32 %v169_v30, %v1491_v19 }
 0x1d3   :  { %v284_v35 = vpop.permute.xlu0 %283 }
 0x1d4   :  { %v286_v36 = vadd.f32 %v284_v35, %v276_v34 }
 0x1d6   :  { %1310 = vtanh.f32 %v286_v36 }
 0x1e3   :  { %v1311_v38 = vpop.eup %1310 }
 0x1e4   :  { %289 = vrot.lane.b32.xlu1 %v1311_v38, %s1407_s21 }
 0x256   :  { %v290_v39 = vpop.permute.xlu1 %289 }
 0x257   :  { %v292_v40 = vmul.f32 %v1309_v31, %v290_v39  ;;  %v171_v31 = vpop.f32.mrf.mxu0 }
 0x259   :  { %294 = vrot.lane.b32.xlu1 %v292_v40, %s1408_s22 }
 0x2cb   :  { %v295_v43 = vpop.permute.xlu1 %294 }
 0x2cc   :  { %1205 = vmatmul.mubr.msk.f32.vlgmr.msra.gmra.mxu1 %vm194_vm2, %v295_v43 }
 0x2cd   :  { %1208 = vmatpush3.msra.mxu1 %v1433_v6  ;;  %1215 = vmatprep.mubr.msk.f32.mxu1 %vm1406_vm1, %v1405_v0 }
 0x2ce   :  { %1209 = vmatprep.subr.mxu1 %v1405_v0 }
 0x2cf   :  { %1210 = vmatpush3.msra.mxu1 %v1440_v8 }
 0x2d0   :  { %1211 = vmatprep.subr.mxu1 %v1405_v0 }
 0x2d1   :  { %1212 = vmatpush3.msra.mxu1 %v1449_v10 }
 0x2d2   :  { %1213 = vmatprep.subr.mxu1 %v1405_v0 }
 0x2d3   :  { %1214 = vmatpush3.msra.mxu1 %v1455_v11 }
 0x2d4   :  { %1218 = vmatprep.subr.mxu1 %v1405_v0 }
 0x38c   :  { %v364_v45 = vpop.f32.mrf.mxu1 }
 0x38d   :  { %v368_v46 = vadd.f32 %v364_v45, %v160_v44 }
 0x38e   :  { %v1206_v47 = vpop.f32.mrf.mxu1 }
 0x38f   :  { %1312 = vtanh.f32 %v368_v46  ;;  %v1121_v49 = vmul.f32 -1.442695, %v368_v46  ;;  %v29_v47 = vld [vmem:[%s1639_s0 + $0x20] sm:$0xff] }
 0x390   :  { %1115 = vmatmul.mubr.msk.f32.gmra.mxu0 %vm63_vm0, %v29_v47 }
 0x391   :  { %1314 = vpow2.f32 %v1121_v49  ;;  %177 = vmatprep.mubr.f32.mxu0 %v1405_v0 }
 0x39c   :  { %v1313_v48 = vpop.eup %1312 }
 0x39d   :  { %378 = vrot.lane.b32.xlu0 %v1313_v48, %s1407_s21  ;;  %v30_v48 = vld [vmem:[%s1639_s0 + $0x28] sm:$0xff]  ;;  %s1409_s0 = smov 96  }
 0x39e   :  { %v1315_v50 = vpop.eup %1314  ;;  %1116 = vmatmul.mubr.msk.f32.gmra.mxu0 %vm63_vm0, %v30_v48 }
 0x39f   :  { %v372_v51 = vadd.f32 1.0, %v1315_v50  ;;  %1237 = vmatprep.mubr.msk.f32.mxu0 %vm1406_vm1, %v1405_v0 }
 0x3a1   :  { %1316 = vrcp.f32 %v372_v51 }
 0x3ae   :  { %v1317_v52 = vpop.eup %1316 }
 0x3af   :  { %v376_v55 = vmul.f32 %v1317_v52, %v286_v36 }
 0x40f   :  { %v379_v53 = vpop.permute.xlu0 %378 }
 0x410   :  { %v381_v54 = vmul.f32 %v1317_v52, %v379_v53 }
 0x412   :  { %383 = vrot.lane.b32.xlu1 %v381_v54, %s1408_s22 }
 0x484   :  { %v384_v56 = vpop.permute.xlu1 %383 }
 0x485   :  { %v386_v57 = vadd.f32 %v384_v56, %v376_v55 }
 0x487   :  { %1318 = vtanh.f32 %v386_v57 }
 0x494   :  { %v1319_v59 = vpop.eup %1318 }
 0x495   :  { %389 = vrot.lane.b32.xlu0 %v1319_v59, %s1407_s21 }
 0x507   :  { %v390_v60 = vpop.permute.xlu0 %389 }
 0x508   :  { %v392_v61 = vmul.f32 %v1317_v52, %v390_v60  ;;  %v174_v52 = vpop.f32.mrf.mxu0 }
 0x50a   :  { %394 = vrot.lane.b32.xlu1 %v392_v61, %s1408_s22  ;;  %v176_v53 = vpop.f32.mrf.mxu0 }
 0x50b   :  { %v59_v53 = vsub.s32 1, %v1483_v13 }
 0x50c   :  { %v179_v54 = vpop.f32.mrf.mxu0 }
 0x50e   :  { %v181_v55 = vpop.f32.mrf.mxu0 }
 0x50f   :  { %v60_v55 = vrot.slane %v1486_v15, %v59_v53 }
 0x57c   :  { %v395_v1 = vpop.permute.xlu1 %394 }
 0x57d   :  { %1216 = vmatmul.mubr.msk.f32.vlgmr.msra.gmra.mxu1 %vm194_vm2, %v395_v1 }
 0x57e   :  { %1219 = vmatpush3.msra.mxu1 %v1433_v6  ;;  %1226 = vmatprep.mubr.msk.f32.mxu1 %vm1406_vm1, %v1405_v0 }
 0x57f   :  { %1220 = vmatprep.subr.mxu1 %v1405_v0 }
 0x580   :  { %1221 = vmatpush3.msra.mxu1 %v1440_v8 }
 0x581   :  { %1222 = vmatprep.subr.mxu1 %v1405_v0 }
 0x582   :  { %1223 = vmatpush3.msra.mxu1 %v1449_v10 }
 0x583   :  { %1224 = vmatprep.subr.mxu1 %v1405_v0 }
 0x584   :  { %1225 = vmatpush3.msra.mxu1 %v1455_v11 }
 0x585   :  { %1240 = vmatprep.subr.mxu1 %v1405_v0 }
 0x63d   :  { %v464_v3 = vpop.f32.mrf.mxu1 }
 0x63e   :  { %v468_v4 = vadd.f32 %v464_v3, %v165_v2 }
 0x63f   :  { %v1217_v5 = vpop.f32.mrf.mxu1 }
 0x640   :  { %1320 = vtanh.f32 %v468_v4  ;;  %v1123_v9 = vmul.f32 -1.442695, %v468_v4 }
 0x642   :  { %1322 = vpow2.f32 %v1123_v9 }
 0x64d   :  { %v1321_v7 = vpop.eup %1320 }
 0x64e   :  { %478 = vrot.lane.b32.xlu0 %v1321_v7, %s1407_s21 }
 0x64f   :  { %v1323_v12 = vpop.eup %1322 }
 0x650   :  { %v472_v14 = vadd.f32 1.0, %v1323_v12 }
 0x652   :  { %1324 = vrcp.f32 %v472_v14 }
 0x65f   :  { %v1325_v17 = vpop.eup %1324 }
 0x660   :  { %v476_v22 = vmul.f32 %v1325_v17, %v386_v57  ;;  %v175_v57 = vadd.f32 %v174_v52, %v1491_v19 }
 0x6c0   :  { %v479_v18 = vpop.permute.xlu0 %478 }
 0x6c1   :  { %v481_v21 = vmul.f32 %v1325_v17, %v479_v18 }
 0x6c3   :  { %483 = vrot.lane.b32.xlu1 %v481_v21, %s1408_s22  ;;  %v180_v21 = vadd.f32 %v179_v54, %v1491_v19  ;;  %v190_v54 = vadd.f32 %v1493_v20, %v1491_v19 }
 0x735   :  { %v484_v24 = vpop.permute.xlu1 %483 }
 0x736   :  { %v486_v25 = vadd.f32 %v484_v24, %v476_v22 }
 0x738   :  { %1326 = vtanh.f32 %v486_v25 }
 0x745   :  { %v1327_v27 = vpop.eup %1326 }
 0x746   :  { %489 = vrot.lane.b32.xlu0 %v1327_v27, %s1407_s21 }
 0x7b8   :  { %v490_v28 = vpop.permute.xlu0 %489 }
 0x7b9   :  { %v492_v29 = vmul.f32 %v1325_v17, %v490_v28 }
 0x7bb   :  { %494 = vrot.lane.b32.xlu1 %v492_v29, %s1408_s22 }
 0x82d   :  { %v495_v32 = vpop.permute.xlu1 %494 }
 0x82e   :  { %1227 = vmatmul.mubr.msk.f32.vlgmr.msra.gmra.mxu1 %vm194_vm2, %v495_v32 }
 0x82f   :  { %1241 = vmatpush3.msra.mxu1 %v1433_v6  ;;  %1248 = vmatprep.mubr.msk.f32.mxu1 %vm1406_vm1, %v1405_v0 }
 0x830   :  { %1242 = vmatprep.subr.mxu1 %v1405_v0 }
 0x831   :  { %1243 = vmatpush3.msra.mxu1 %v1440_v8 }
 0x832   :  { %1244 = vmatprep.subr.mxu1 %v1405_v0 }
 0x833   :  { %1245 = vmatpush3.msra.mxu1 %v1449_v10 }
 0x834   :  { %1246 = vmatprep.subr.mxu1 %v1405_v0 }
 0x835   :  { %1247 = vmatpush3.msra.mxu1 %v1455_v11 }
 0x836   :  { %1262 = vmatprep.subr.mxu1 %v1405_v0 }
 0x8ee   :  { %v564_v34 = vpop.f32.mrf.mxu1 }
 0x8ef   :  { %v568_v35 = vadd.f32 %v564_v34, %v170_v33 }
 0x8f0   :  { %v1228_v36 = vpop.f32.mrf.mxu1 }
 0x8f1   :  { %1328 = vtanh.f32 %v568_v35  ;;  %v1125_v38 = vmul.f32 -1.442695, %v568_v35  ;;  %v185_v36 = vadd.f32 %v1488_v16, %v1491_v19 }
 0x8f3   :  { %1330 = vpow2.f32 %v1125_v38 }
 0x8fe   :  { %v1329_v37 = vpop.eup %1328 }
 0x8ff   :  { %578 = vrot.lane.b32.xlu0 %v1329_v37, %s1407_s21 }
 0x900   :  { %v1331_v39 = vpop.eup %1330 }
 0x901   :  { %v572_v40 = vadd.f32 1.0, %v1331_v39 }
 0x903   :  { %1332 = vrcp.f32 %v572_v40 }
 0x910   :  { %v1333_v41 = vpop.eup %1332 }
 0x911   :  { %v576_v44 = vmul.f32 %v1333_v41, %v486_v25 }
 0x971   :  { %v579_v42 = vpop.permute.xlu0 %578 }
 0x972   :  { %v581_v43 = vmul.f32 %v1333_v41, %v579_v42 }
 0x974   :  { %583 = vrot.lane.b32.xlu1 %v581_v43, %s1408_s22 }
 0x9e6   :  { %v584_v45 = vpop.permute.xlu1 %583 }
 0x9e7   :  { %v586_v46 = vadd.f32 %v584_v45, %v576_v44 }
 0x9e9   :  { %1334 = vtanh.f32 %v586_v46 }
 0x9f6   :  { %v1335_v49 = vpop.eup %1334 }
 0x9f7   :  { %589 = vrot.lane.b32.xlu0 %v1335_v49, %s1407_s21 }
 0xa69   :  { %v590_v50 = vpop.permute.xlu0 %589 }
 0xa6a   :  { %v592_v51 = vmul.f32 %v1333_v41, %v590_v50 }
 0xa6c   :  { %594 = vrot.lane.b32.xlu1 %v592_v51, %s1408_s22 }
 0xade   :  { %v595_v56 = vpop.permute.xlu1 %594 }
 0xadf   :  { %1238 = vmatmul.mubr.msk.f32.vlgmr.msra.gmra.mxu0 %vm194_vm2, %v595_v56 }
 0xae0   :  { %1252 = vmatpush3.msra.mxu0 %v1433_v6  ;;  %1259 = vmatprep.mubr.msk.f32.mxu0 %vm1406_vm1, %v1405_v0 }
 0xae1   :  { %1253 = vmatprep.subr.mxu0 %v1405_v0 }
 0xae2   :  { %1254 = vmatpush3.msra.mxu0 %v1440_v8 }
 0xae3   :  { %1255 = vmatprep.subr.mxu0 %v1405_v0 }
 0xae4   :  { %1256 = vmatpush3.msra.mxu0 %v1449_v10 }
 0xae5   :  { %1257 = vmatprep.subr.mxu0 %v1405_v0 }
 0xae6   :  { %1258 = vmatpush3.msra.mxu0 %v1455_v11 }
 0xae7   :  { %1273 = vmatprep.subr.mxu0 %v1405_v0 }
 0xb9f   :  { %v664_v58 = vpop.f32.mrf.mxu0 }
 0xba0   :  { %v668_v59 = vadd.f32 %v664_v58, %v175_v57 }
 0xba1   :  { %v1239_v60 = vpop.f32.mrf.mxu0 }
 0xba2   :  { %1336 = vtanh.f32 %v668_v59  ;;  %v1127_v62 = vmul.f32 -1.442695, %v668_v59  ;;  %v192_v59 = vadd.f32 %v1496_v23, %v60_v55 }
 0xba4   :  { %1338 = vpow2.f32 %v1127_v62  ;;  %v1134_v13 = vmul.f32 -1.442695, %v192_v59 }
 0xbaf   :  { %v1337_v61 = vpop.eup %1336 }
 0xbb0   :  { %678 = vrot.lane.b32.xlu0 %v1337_v61, %s1407_s21 }
 0xbb1   :  { %v1339_v63 = vpop.eup %1338 }
 0xbb2   :  { %v672_v1 = vadd.f32 1.0, %v1339_v63 }
 0xbb4   :  { %1340 = vrcp.f32 %v672_v1 }
 0xbc1   :  { %v1341_v2 = vpop.eup %1340 }
 0xbc2   :  { %v676_v5 = vmul.f32 %v1341_v2, %v586_v46 }
 0xc22   :  { %v679_v3 = vpop.permute.xlu0 %678 }
 0xc23   :  { %v681_v4 = vmul.f32 %v1341_v2, %v679_v3 }
 0xc25   :  { %683 = vrot.lane.b32.xlu1 %v681_v4, %s1408_s22 }
 0xc97   :  { %v684_v7 = vpop.permute.xlu1 %683 }
 0xc98   :  { %v686_v9 = vadd.f32 %v684_v7, %v676_v5 }
 0xc9a   :  { %1342 = vtanh.f32 %v686_v9 }
 0xca7   :  { %v1343_v12 = vpop.eup %1342 }
 0xca8   :  { %689 = vrot.lane.b32.xlu0 %v1343_v12, %s1407_s21 }
 0xd1a   :  { %v690_v14 = vpop.permute.xlu0 %689 }
 0xd1b   :  { %v692_v17 = vmul.f32 %v1341_v2, %v690_v14 }
 0xd1d   :  { %694 = vrot.lane.b32.xlu1 %v692_v17, %s1408_s22  ;;  %v48_v17 = vld [vmem:[#allocation2 + $0xd0] sm:$0xff] }
 0xd8f   :  { %v695_v18 = vpop.permute.xlu1 %694 }
 0xd90   :  { %1249 = vmatmul.mubr.msk.f32.vlgmr.msra.gmra.mxu1 %vm194_vm2, %v695_v18  ;;  %v47_v18 = vld [vmem:[#allocation2 + $0xc0] sm:$0xff] }
 0xd91   :  { %1263 = vmatpush3.msra.mxu1 %v1433_v6  ;;  %1270 = vmatprep.mubr.msk.f32.mxu1 %vm1406_vm1, %v1405_v0 }
 0xd92   :  { %1264 = vmatprep.subr.mxu1 %v1405_v0 }
 0xd93   :  { %1265 = vmatpush3.msra.mxu1 %v1440_v8 }
 0xd94   :  { %1266 = vmatprep.subr.mxu1 %v1405_v0 }
 0xd95   :  { %1267 = vmatpush3.msra.mxu1 %v1449_v10 }
 0xd96   :  { %1268 = vmatprep.subr.mxu1 %v1405_v0 }
 0xd97   :  { %1269 = vmatpush3.msra.mxu1 %v1455_v11 }
 0xe50   :  { %v764_v22 = vpop.f32.mrf.mxu1 }
 0xe51   :  { %v768_v24 = vadd.f32 %v764_v22, %v180_v21  ;;  %v46_v21 = vld [vmem:[#allocation2 + $0xb0] sm:$0xff]  ;;  %v45_v22 = vld [vmem:[#allocation2 + $0xa0] sm:$0xff] }
 0xe52   :  { %v1250_v6 = vpop.f32.mrf.mxu1 }
 0xe53   :  { %1344 = vtanh.f32 %v768_v24  ;;  %v1129_v26 = vmul.f32 -1.442695, %v768_v24  ;;  %v44_v24 = vld [vmem:[#allocation2 + $0x90] sm:$0xff]  ;;  %v43_v6 = vld [vmem:[#allocation2 + $0x80] sm:$0xff] }
 0xe55   :  { %1346 = vpow2.f32 %v1129_v26  ;;  %v42_v26 = vld [vmem:[#allocation2 + $0x70] sm:$0xff] }
 0xe60   :  { %v1345_v25 = vpop.eup %1344 }
 0xe61   :  { %778 = vrot.lane.b32.xlu0 %v1345_v25, %s1407_s21 }
 0xe62   :  { %v1347_v8 = vpop.eup %1346 }
 0xe63   :  { %v772_v27 = vadd.f32 1.0, %v1347_v8 }
 0xe65   :  { %1348 = vrcp.f32 %v772_v27 }
 0xe72   :  { %v1349_v28 = vpop.eup %1348 }
 0xe73   :  { %v776_v11 = vmul.f32 %v1349_v28, %v686_v9 }
 0xed3   :  { %v779_v10 = vpop.permute.xlu0 %778 }
 0xed4   :  { %v781_v29 = vmul.f32 %v1349_v28, %v779_v10 }
 0xed6   :  { %783 = vrot.lane.b32.xlu1 %v781_v29, %s1408_s22 }
 0xf48   :  { %v784_v30 = vpop.permute.xlu1 %783 }
 0xf49   :  { %v786_v31 = vadd.f32 %v784_v30, %v776_v11 }
 0xf4b   :  { %1350 = vtanh.f32 %v786_v31 }
 0xf58   :  { %v1351_v32 = vpop.eup %1350 }
 0xf59   :  { %789 = vrot.lane.b32.xlu0 %v1351_v32, %s1407_s21  ;;  %v51_v32 = vld [vmem:[#allocation2 + $0xe1] ss:$0 sm:$0xff] }
 0xfcb   :  { %v790_v33 = vpop.permute.xlu0 %789 }
 0xfcc   :  { %v792_v34 = vmul.f32 %v1349_v28, %v790_v33  ;;  %v41_v28 = vld [vmem:[#allocation2 + $0x60] sm:$0xff] }
 0xfce   :  { %794 = vrot.lane.b32.xlu1 %v792_v34, %s1408_s22 }
0x1040   :  { %v795_v35 = vpop.permute.xlu1 %794 }
0x1041   :  { %1260 = vmatmul.mubr.msk.f32.vlgmr.msra.gmra.mxu0 %vm194_vm2, %v795_v35 }
0x1042   :  { %1289 = vmatprep.mubr.msk.f32.mxu0 %vm1406_vm1, %v1405_v0  ;;  %1274 = vmatpush3.msra.mxu0 %v48_v17 }
0x1043   :  { %1275 = vmatprep.subr.mxu0 %v1405_v0 }
0x1044   :  { %1276 = vmatpush3.msra.mxu0 %v47_v18 }
0x1045   :  { %1277 = vmatprep.subr.mxu0 %v1405_v0 }
0x1046   :  { %1278 = vmatpush3.msra.mxu0 %v46_v21 }
0x1047   :  { %1279 = vmatprep.subr.mxu0 %v1405_v0 }
0x1048   :  { %1280 = vmatpush3.msra.mxu0 %v45_v22 }
0x1049   :  { %1281 = vmatprep.subr.mxu0 %v1405_v0 }
0x104a   :  { %1282 = vmatpush3.msra.mxu0 %v44_v24 }
0x104b   :  { %1283 = vmatprep.subr.mxu0 %v1405_v0 }
0x104c   :  { %1284 = vmatpush3.msra.mxu0 %v43_v6 }
0x104d   :  { %1285 = vmatprep.subr.mxu0 %v1405_v0 }
0x104e   :  { %1286 = vmatpush3.msra.mxu0 %v42_v26 }
0x104f   :  { %1287 = vmatprep.subr.mxu0 %v1405_v0 }
0x1050   :  { %1288 = vmatpush3.msra.mxu0 %v41_v28 }
0x1101   :  { %v864_v37 = vpop.f32.mrf.mxu0 }
0x1102   :  { %v868_v38 = vadd.f32 %v864_v37, %v185_v36 }
0x1103   :  { %v1261_v39 = vpop.f32.mrf.mxu0 }
0x1104   :  { %1352 = vtanh.f32 %v868_v38  ;;  %v1131_v41 = vmul.f32 -1.442695, %v868_v38 }
0x1106   :  { %1354 = vpow2.f32 %v1131_v41 }
0x1111   :  { %v1353_v40 = vpop.eup %1352 }
0x1112   :  { %878 = vrot.lane.b32.xlu0 %v1353_v40, %s1407_s21 }
0x1113   :  { %v1355_v42 = vpop.eup %1354 }
0x1114   :  { %v872_v43 = vadd.f32 1.0, %v1355_v42 }
0x1116   :  { %1356 = vrcp.f32 %v872_v43 }
0x1123   :  { %v1357_v44 = vpop.eup %1356 }
0x1124   :  { %v876_v47 = vmul.f32 %v1357_v44, %v786_v31 }
0x1184   :  { %v879_v45 = vpop.permute.xlu0 %878 }
0x1185   :  { %v881_v46 = vmul.f32 %v1357_v44, %v879_v45 }
0x1187   :  { %883 = vrot.lane.b32.xlu1 %v881_v46, %s1408_s22 }
0x11f9   :  { %v884_v48 = vpop.permute.xlu1 %883 }
0x11fa   :  { %v886_v16 = vadd.f32 %v884_v48, %v876_v47 }
0x11fc   :  { %1358 = vtanh.f32 %v886_v16 }
0x1209   :  { %v1359_v49 = vpop.eup %1358 }
0x120a   :  { %889 = vrot.lane.b32.xlu0 %v1359_v49, %s1407_s21 }
0x127c   :  { %v890_v50 = vpop.permute.xlu0 %889 }
0x127d   :  { %v892_v51 = vmul.f32 %v1357_v44, %v890_v50 }
0x127f   :  { %894 = vrot.lane.b32.xlu1 %v892_v51, %s1408_s22 }
0x12f1   :  { %v895_v52 = vpop.permute.xlu1 %894 }
0x12f2   :  { %1271 = vmatmul.mubr.msk.f32.vlgmr.msra.gmra.mxu1 %vm194_vm2, %v895_v52 }
0x13b2   :  { %v964_v56 = vpop.f32.mrf.mxu1 }
0x13b3   :  { %v968_v57 = vadd.f32 %v964_v56, %v190_v54 }
0x13b4   :  { %v1272_v58 = vpop.f32.mrf.mxu1 }
0x13b5   :  { %1360 = vtanh.f32 %v968_v57  ;;  %v1133_v62 = vmul.f32 -1.442695, %v968_v57 }
0x13b6   :  { %1362 = vtanh.f32 %v192_v59 }
0x13b7   :  { %1364 = vpow2.f32 %v1133_v62 }
0x13b8   :  { %1366 = vpow2.f32 %v1134_v13 }
0x13c2   :  { %v1361_v60 = vpop.eup %1360 }
0x13c3   :  { %978 = vrot.lane.b32.xlu0 %v1361_v60, %s1407_s21  ;;  %v1363_v61 = vpop.eup %1362 }
0x13c4   :  { %v1365_v19 = vpop.eup %1364 }
0x13c5   :  { %v972_v20 = vadd.f32 1.0, %v1365_v19  ;;  %v1367_v15 = vpop.eup %1366 }
0x13c6   :  { %v996_v63 = vadd.f32 1.0, %v1367_v15 }
0x13c7   :  { %1001 = vrot.lane.b32.xlu0 %v1363_v61, %s1407_s21  ;;  %1368 = vrcp.f32 %v972_v20 }
0x13c8   :  { %1370 = vrcp.f32 %v996_v63 }
0x13d4   :  { %v1369_v1 = vpop.eup %1368 }
0x13d5   :  { %v1371_v3 = vpop.eup %1370  ;;  %v976_v9 = vmul.f32 %v1369_v1, %v886_v16 }
0x1435   :  { %v979_v23 = vpop.permute.xlu0 %978 }
0x1436   :  { %v981_v2 = vmul.f32 %v1369_v1, %v979_v23 }
0x1438   :  { %983 = vrot.lane.b32.xlu1 %v981_v2, %s1408_s22 }
0x1439   :  { %v1002_v4 = vpop.permute.xlu0 %1001 }
0x143a   :  { %v1004_v5 = vmul.f32 %v1371_v3, %v1002_v4 }
0x143c   :  { %1372 = vtanh.f32 %v1004_v5 }
0x1449   :  { %v1373_v7 = vpop.eup %1372 }
0x144a   :  { %1007 = vrot.lane.b32.xlu0 %v1373_v7, %s1409_s0 }
0x14aa   :  { %v984_v12 = vpop.permute.xlu1 %983 }
0x14ab   :  { %v986_v14 = vadd.f32 %v984_v12, %v976_v9 }
0x14ad   :  { %1374 = vtanh.f32 %v986_v14 }
0x14ba   :  { %v1375_v25 = vpop.eup %1374 }
0x14bb   :  { %989 = vrot.lane.b32.xlu1 %v1375_v25, %s1407_s21 }
0x14bc   :  { %v1008_v8 = vpop.permute.xlu0 %1007 }
0x14bd   :  { %v1010_v27 = vmul.f32 %v1371_v3, %v1008_v8 }
0x14bf   :  { %1016 = vrot.lane.b32.xlu0 %v1010_v27, %s1407_s21 }
0x152d   :  { %v990_v10 = vpop.permute.xlu1 %989 }
0x152e   :  { %v992_v29 = vmul.f32 %v1369_v1, %v990_v10 }
0x1530   :  { %1012 = vrot.lane.b32.xlu1 %v992_v29, %s1408_s22 }
0x1531   :  { %v1017_v11 = vpop.permute.xlu0 %1016 }
0x15a2   :  { %v1013_v30 = vpop.permute.xlu1 %1012 }
0x15a3   :  { %v1019_v31 = vsel %vm194_vm2, %v1013_v30, %v1017_v11 }
0x15a4   :  { %1290 = vmatmul.mubr.msk.f32.vlgmr.msra.gmra.mxu0 %vm1020_vm3, %v1019_v31 }
0x1664   :  { %v1090_v33 = vpop.f32.mrf.mxu0 }
0x1665   :  { %v1091_v34 = vadd.f32 %v1090_v33, %v51_v32 }
0x1666   :  { %v1291_v35 = vpop.f32.mrf.mxu0 }
0x1667   :  { %1094 = vmax.xlane.f32.xlu1 %v1091_v34 }
0x16f0   :  { %v1095_v36 = vpop.xlane.xlu1 %1094 }
0x16f1   :  { %v1096_v37 = vsub.f32 %v1091_v34, %v1095_v36 }
0x16f3   :  { %v1097_v0 = vmul.f32 1.442695, %v1096_v37 }
0x16f5   :  { %1376 = vpow2.f32 %v1097_v0 }
0x1702   :  { %v1377_v38 = vpop.eup %1376 }
0x1703   :  { %1099 = vadd.xlane.f32.xlu0 %v1377_v38 }
0x178c   :  { %v1100_v39 = vpop.xlane.xlu0 %1099 }
0x178d   :  { %1378 = vlog2.f32 %v1100_v39 }
0x179a   :  { %v1379_v40 = vpop.eup %1378 }
0x179b   :  { %v1102_v41 = vmul.f32 0.6931472, %v1379_v40 }
0x179d   :  { %v1103_v42 = vadd.f32 %v1102_v41, %v1095_v36 }
0x179f   :  { %v1104_v43 = vsub.f32 %v1091_v34, %v1103_v42 }
0x17a1   :  { %1105 = vst [vmem:[%s1641_s2] sm:$0xff] %v1104_v43 }
0x17a2   :  { %1110 = vsyncpa [#allocation3], 1 }

</bundles_post_ra>
